<compile_context>
chip_gen: v7x
topology: tpu7x:2x2x1
jax: 0.10.0
libtpu: 0.0.40
codegen_flags: <defaults>
</compile_context>

<pallas_src>
import numpy as np
import jax
import jax.numpy as jnp
from jax import lax
from jax.experimental import pallas as pl
from jax.experimental.pallas import tpu as pltpu


def _make_kernel(field_dims, output_dim, mxu_min_o=16):
    """Build the kernel with the per-field (start, size) table slices baked in."""
    field_dims = tuple(int(d) for d in field_dims)
    starts = np.concatenate(([0], np.cumsum(field_dims)[:-1])).astype(int)
    field_slices = tuple((int(s), int(d)) for s, d in zip(starts, field_dims))
    use_mxu = output_dim > mxu_min_o

    def kernel(x_ref, table_ref, bias_ref, o_ref):
        # x_ref:     (F, Bt) int32   raw per-field indices (batch on lanes)
        # table_ref: (V, O)  f32     embedding table (grid-invariant block)
        # bias_ref:  (O, 1)  f32
        # o_ref:     (O, Bt) f32
        bt = x_ref.shape[1]

        if not use_mxu:
            # Small O: VPU multiply + XLU sublane reduce, accumulated per field.
            # Peak live = (max_field_dim, Bt); no (V, Bt) one-hot is ever built
            # and the MXU slot stays free.
            # (F is small for FM models; for F >~ 16 with equal-sized fields,
            #  switch this static unroll to lax.fori_loop to bound live ranges.)
            acc = None
            for f, (start, size) in enumerate(field_slices):
                # Field f only hits table rows [start, start+size): compare
                # against the local index range only (~F x less VALU work).
                iota_f = lax.broadcasted_iota(jnp.int32, (size, bt), 0)
                hit = (x_ref[f:f + 1, :] == iota_f).astype(jnp.float32)  # (size, Bt)
                tab_f = table_ref[start:start + size, :]                 # (size, O)
                if output_dim == 1:
                    part = jnp.sum(hit * tab_f, axis=0, keepdims=True)   # (1, Bt)
                else:
                    part = jnp.concatenate(
                        [jnp.sum(hit * tab_f[:, oc:oc + 1], axis=0, keepdims=True)
                         for oc in range(output_dim)], axis=0)           # (O, Bt)
                acc = part if acc is None else acc + part
            out = acc
        else:
            # Large O: per-field one-hots live in disjoint vocab sub-ranges, so
            # no accumulation is needed -- concat to (V, Bt) and contract over
            # the vocab axis on the MXU -> (O, Bt).
            hits = []
            for f, (start, size) in enumerate(field_slices):
                iota_f = lax.broadcasted_iota(jnp.int32, (size, bt), 0)
                hits.append((x_ref[f:f + 1, :] == iota_f).astype(jnp.float32))
            counts = jnp.concatenate(hits, axis=0)                       # (V, Bt)
            out = lax.dot_general(
                table_ref[...], counts,
                dimension_numbers=(((0,), (0,)), ((), ())),
                preferred_element_type=jnp.float32)

        o_ref[...] = out + bias_ref[...]                    # bias broadcast over lanes

    return kernel


def _num_tensorcores_per_chip():
    """Best-effort generation sniff: v7x has 2 TensorCores per chip."""
    try:
        kind = jax.devices()[0].device_kind.lower()
    except Exception:
        return 1
    return 2 if "v7" in kind else 1


def _pick_tile_b(batch, *, live_rows_per_lane_col, num_tc=1):
    """Lane-dense batch tile (multiple of 128), vreg- and TC-aware.

    v5e/v6e (1 TC): largest tile that keeps the compare/accumulate loop in
    registers (~48 of 64 vregs) -- a single grid step is fine, extra steps only
    add ~0.35 us each.  v7x (2 TCs): additionally prefer an even number of
    balanced steps so neither core idles under dimension_semantics=("parallel",).
    """
    lane = 128
    bp = pl.cdiv(batch, lane) * lane
    max_cols = max(1, 48 // max(1, live_rows_per_lane_col))
    tile = min(bp, max_cols * lane, 1024)
    tile = max(lane, (tile // lane) * lane)
    if num_tc >= 2 and bp > lane:
        steps = pl.cdiv(bp, tile)
        if steps % 2 == 1:  # odd (incl. 1): split steps in half if that evens them out
            half = max(lane, ((tile // 2) // lane) * lane)
            if pl.cdiv(bp, half) % 2 == 0:
                tile = half
    return tile


def _vmem_bytes_estimate(num_fields, vocab, output_dim, tile_b):
    """Rough VMEM footprint: (sublane,lane)-padded blocks x buffer count."""
    lane, sub = 128, 8

    def padded(r, c):
        return pl.cdiv(r, sub) * sub * pl.cdiv(c, lane) * lane * 4

    return (2 * padded(num_fields, tile_b)     # index tiles (double buffered)
            + 2 * padded(output_dim, tile_b)   # output tiles
            + 2 * padded(vocab, output_dim)    # table (revisited block, 2 bufs)
            + 2 * padded(output_dim, 1))       # bias


def features_linear(x, field_dims, table, bias, *, tile_b=None, mxu_min_o=16):
    """x: (B, F) int; field_dims: static tuple; table: (V, O) f32; bias: (O,) f32."""
    field_dims = tuple(int(d) for d in field_dims)
    B, F = x.shape
    V, O = table.shape
    assert len(field_dims) == F and sum(field_dims) == V

    # Batch-on-lanes layout.  Offsets are applied statically inside the kernel
    # as per-field table-row slices, so there is no offsets operand at all.
    x_t = x.T.astype(jnp.int32)                          # (F, B)
    table = table.astype(jnp.float32)                    # (V, O)
    bias_col = bias.reshape(O, 1).astype(jnp.float32)    # (O, 1)

    use_mxu = O > mxu_min_o
    max_dim = max(field_dims)
    if use_mxu:
        live_rows = (pl.cdiv(V, 8) + 2 * pl.cdiv(max_dim, 8)
                     + pl.cdiv(O, 8) + pl.cdiv(F, 8))
    else:
        live_rows = 3 * pl.cdiv(max_dim, 8) + pl.cdiv(O, 8) + pl.cdiv(F, 8)

    if tile_b is None:
        tile_b = _pick_tile_b(B, live_rows_per_lane_col=live_rows,
                              num_tc=_num_tensorcores_per_chip())
    Bp = pl.cdiv(B, tile_b) * tile_b
    if Bp != B:
        # Pad with index 0 (valid for every field); padded lanes sliced off below.
        x_t = jnp.pad(x_t, ((0, 0), (0, Bp - B)))

    # Raise the scoped VMEM limit only if the estimated footprint needs it
    # (never triggered at small shapes; capped under v7x's 64 MiB physical).
    est = _vmem_bytes_estimate(F, V, O, tile_b)
    vmem_limit = None if est <= (24 << 20) else min(int(est * 1.5) + (4 << 20), 64 << 20)

    kernel = _make_kernel(field_dims, O, mxu_min_o)

    out_t = pl.pallas_call(
        kernel,
        out_shape=jax.ShapeDtypeStruct((O, Bp), jnp.float32),
        grid_spec=pltpu.PrefetchScalarGridSpec(
            num_scalar_prefetch=0,
            grid=(Bp // tile_b,),
            in_specs=[
                pl.BlockSpec((F, tile_b), lambda i: (0, i)),   # batch tile of indices
                # Grid-invariant blocks (block index never changes -> DMA'd once,
                # revisited).  For large V, single-buffer the table
                # (pipeline_mode=pl.Buffered(1)) or use the gather path (TODO above).
                pl.BlockSpec((V, O), lambda i: (0, 0)),        # full table
                pl.BlockSpec((O, 1), lambda i: (0, 0)),        # bias
            ],
            out_specs=pl.BlockSpec((O, tile_b), lambda i: (0, i)),
        ),
        compiler_params=pltpu.CompilerParams(
            dimension_semantics=("parallel",),
            vmem_limit_bytes=vmem_limit),
    )(x_t, table, bias_col)

    return out_t[:, :B].T                                # (B, O)


if __name__ == "__main__":
    # Small shapes consistent with the module.
    field_dims = (3, 4, 5, 6)
    batch = 256
    num_fields = len(field_dims)
    vocab = int(sum(field_dims))

    key = jax.random.PRNGKey(0)
    k_t1, k_t2, k_x = jax.random.split(key, 3)
    offsets = jnp.asarray(np.array((0, *np.cumsum(field_dims)[:-1]), dtype=np.int32))

    # Random per-field indices, each within its own field cardinality.
    keys = jax.random.split(k_x, num_fields)
    x = jnp.stack([jax.random.randint(keys[f], (batch,), 0, field_dims[f],
                                      dtype=jnp.int32)
                   for f in range(num_fields)], axis=1)          # (B, F)

    def run_case(output_dim, k_table):
        table = (jax.random.normal(k_table, (vocab, output_dim), dtype=jnp.float32)
                 * 0.01)
        bias = jnp.zeros((output_dim,), dtype=jnp.float32)
        out = jax.block_until_ready(features_linear(x, field_dims, table, bias))
        # Pure-JAX reference (same math as the PyTorch module).
        ref = jnp.sum(table[x + offsets[None, :]], axis=1) + bias[None, :]
        assert out.shape == (batch, output_dim)
        np.testing.assert_allclose(np.asarray(out), np.asarray(ref),
                                   rtol=1e-6, atol=1e-6)

    run_case(1, k_t1)   # module default (O == 1, VPU + sublane-reduce path)
    run_case(4, k_t2)   # small O > 1 (per-column VPU path, MXU still unused)
    print("KERNEL_OK")
</pallas_src>

<mosaic_0001>
module attributes {stable_mosaic.version = 11 : i64} {
  func.func @kernel(%arg0: i32, %arg1: memref<4x256xi32, #tpu.memory_space<vmem>>, %arg2: memref<18x1xf32, #tpu.memory_space<vmem>>, %arg3: memref<1x1xf32, #tpu.memory_space<vmem>>, %arg4: memref<1x256xf32, #tpu.memory_space<vmem>>) attributes {dimension_semantics = [#tpu.dimension_semantics<parallel>], iteration_bounds = array<i64: 1>, scalar_prefetch = 0 : i64, scratch_operands = 0 : i64, tpu.core_type = #tpu.core_type<tc>, window_params = [{transform_indices = @transform_0, window_bounds = array<i64: 4, 256>}, {pipeline_mode = #tpu.pipeline_mode<synchronous>, transform_indices = @transform_1, window_bounds = array<i64: 18, 1>}, {pipeline_mode = #tpu.pipeline_mode<synchronous>, transform_indices = @transform_2, window_bounds = array<i64: 1, 1>}, {transform_indices = @transform_3, window_bounds = array<i64: 1, 256>}]} {
    %0 = tpu.iota {dimensions = array<i32: 0>} : vector<3x256xi32>
    %c0 = arith.constant 0 : index
    %c0_0 = arith.constant 0 : index
    %1 = vector.load %arg1[%c0, %c0_0] : memref<4x256xi32, #tpu.memory_space<vmem>>, vector<1x256xi32>
    %2 = vector.broadcast %1 : vector<1x256xi32> to vector<3x256xi32>
    %3 = arith.cmpi eq, %2, %0 : vector<3x256xi32>
    %4 = arith.extui %3 : vector<3x256xi1> to vector<3x256xi32>
    %5 = arith.sitofp %4 : vector<3x256xi32> to vector<3x256xf32>
    %c0_1 = arith.constant 0 : index
    %c0_2 = arith.constant 0 : index
    %6 = vector.load %arg2[%c0_1, %c0_2] : memref<18x1xf32, #tpu.memory_space<vmem>>, vector<3x1xf32>
    %7 = vector.broadcast %6 : vector<3x1xf32> to vector<3x256xf32>
    %8 = arith.mulf %5, %7 : vector<3x256xf32>
    %cst = arith.constant dense<0.000000e+00> : vector<256xf32>
    %9 = vector.multi_reduction <add>, %8, %cst [0] : vector<3x256xf32> to vector<256xf32>
    %10 = vector.shape_cast %9 : vector<256xf32> to vector<1x256xf32>
    %11 = tpu.iota {dimensions = array<i32: 0>} : vector<4x256xi32>
    %c1 = arith.constant 1 : index
    %c0_3 = arith.constant 0 : index
    %12 = vector.load %arg1[%c1, %c0_3] : memref<4x256xi32, #tpu.memory_space<vmem>>, vector<1x256xi32>
    %13 = vector.broadcast %12 : vector<1x256xi32> to vector<4x256xi32>
    %14 = arith.cmpi eq, %13, %11 : vector<4x256xi32>
    %15 = arith.extui %14 : vector<4x256xi1> to vector<4x256xi32>
    %16 = arith.sitofp %15 : vector<4x256xi32> to vector<4x256xf32>
    %c3 = arith.constant 3 : index
    %c0_4 = arith.constant 0 : index
    %17 = vector.load %arg2[%c3, %c0_4] : memref<18x1xf32, #tpu.memory_space<vmem>>, vector<4x1xf32>
    %18 = vector.broadcast %17 : vector<4x1xf32> to vector<4x256xf32>
    %19 = arith.mulf %16, %18 : vector<4x256xf32>
    %cst_5 = arith.constant dense<0.000000e+00> : vector<256xf32>
    %20 = vector.multi_reduction <add>, %19, %cst_5 [0] : vector<4x256xf32> to vector<256xf32>
    %21 = vector.shape_cast %20 : vector<256xf32> to vector<1x256xf32>
    %22 = arith.addf %10, %21 : vector<1x256xf32>
    %23 = tpu.iota {dimensions = array<i32: 0>} : vector<5x256xi32>
    %c2 = arith.constant 2 : index
    %c0_6 = arith.constant 0 : index
    %24 = vector.load %arg1[%c2, %c0_6] : memref<4x256xi32, #tpu.memory_space<vmem>>, vector<1x256xi32>
    %25 = vector.broadcast %24 : vector<1x256xi32> to vector<5x256xi32>
    %26 = arith.cmpi eq, %25, %23 : vector<5x256xi32>
    %27 = arith.extui %26 : vector<5x256xi1> to vector<5x256xi32>
    %28 = arith.sitofp %27 : vector<5x256xi32> to vector<5x256xf32>
    %c7 = arith.constant 7 : index
    %c0_7 = arith.constant 0 : index
    %29 = vector.load %arg2[%c7, %c0_7] : memref<18x1xf32, #tpu.memory_space<vmem>>, vector<5x1xf32>
    %30 = vector.broadcast %29 : vector<5x1xf32> to vector<5x256xf32>
    %31 = arith.mulf %28, %30 : vector<5x256xf32>
    %cst_8 = arith.constant dense<0.000000e+00> : vector<256xf32>
    %32 = vector.multi_reduction <add>, %31, %cst_8 [0] : vector<5x256xf32> to vector<256xf32>
    %33 = vector.shape_cast %32 : vector<256xf32> to vector<1x256xf32>
    %34 = arith.addf %22, %33 : vector<1x256xf32>
    %35 = tpu.iota {dimensions = array<i32: 0>} : vector<6x256xi32>
    %c3_9 = arith.constant 3 : index
    %c0_10 = arith.constant 0 : index
    %36 = vector.load %arg1[%c3_9, %c0_10] : memref<4x256xi32, #tpu.memory_space<vmem>>, vector<1x256xi32>
    %37 = vector.broadcast %36 : vector<1x256xi32> to vector<6x256xi32>
    %38 = arith.cmpi eq, %37, %35 : vector<6x256xi32>
    %39 = arith.extui %38 : vector<6x256xi1> to vector<6x256xi32>
    %40 = arith.sitofp %39 : vector<6x256xi32> to vector<6x256xf32>
    %c12 = arith.constant 12 : index
    %c0_11 = arith.constant 0 : index
    %41 = vector.load %arg2[%c12, %c0_11] : memref<18x1xf32, #tpu.memory_space<vmem>>, vector<6x1xf32>
    %42 = vector.broadcast %41 : vector<6x1xf32> to vector<6x256xf32>
    %43 = arith.mulf %40, %42 : vector<6x256xf32>
    %cst_12 = arith.constant dense<0.000000e+00> : vector<256xf32>
    %44 = vector.multi_reduction <add>, %43, %cst_12 [0] : vector<6x256xf32> to vector<256xf32>
    %45 = vector.shape_cast %44 : vector<256xf32> to vector<1x256xf32>
    %46 = arith.addf %34, %45 : vector<1x256xf32>
    %c0_13 = arith.constant 0 : index
    %c0_14 = arith.constant 0 : index
    %47 = vector.load %arg3[%c0_13, %c0_14] : memref<1x1xf32, #tpu.memory_space<vmem>>, vector<1x1xf32>
    %48 = vector.broadcast %47 : vector<1x1xf32> to vector<1x256xf32>
    %49 = arith.addf %46, %48 : vector<1x256xf32>
    %c0_15 = arith.constant 0 : index
    %c0_16 = arith.constant 0 : index
    %50 = vector.load %arg4[%c0_15, %c0_16] : memref<1x256xf32, #tpu.memory_space<vmem>>, vector<1x256xf32>
    tpu.vector_store %arg4[%c0_15, %c0_16], %49 {strides = array<i32>} : memref<1x256xf32, #tpu.memory_space<vmem>>, vector<1x256xf32>,
    return
  }
  func.func @transform_0(%arg0: i32) -> (i32, i32) {
    %c0_i32 = arith.constant 0 : i32
    %c0_i32_0 = arith.constant 0 : i32
    return %c0_i32, %arg0 : i32, i32
  }
  func.func @transform_1(%arg0: i32) -> (i32, i32) {
    %c0_i32 = arith.constant 0 : i32
    %c0_i32_0 = arith.constant 0 : i32
    %c0_i32_1 = arith.constant 0 : i32
    return %c0_i32, %c0_i32_0 : i32, i32
  }
  func.func @transform_2(%arg0: i32) -> (i32, i32) {
    %c0_i32 = arith.constant 0 : i32
    %c0_i32_0 = arith.constant 0 : i32
    %c0_i32_1 = arith.constant 0 : i32
    return %c0_i32, %c0_i32_0 : i32, i32
  }
  func.func @transform_3(%arg0: i32) -> (i32, i32) {
    %c0_i32 = arith.constant 0 : i32
    %c0_i32_0 = arith.constant 0 : i32
    return %c0_i32, %arg0 : i32, i32
  }
}

</mosaic_0001>

<bundles_post_ra>
// kernel: tpu_custom_call.1
= control target key start
LH: loop header
LB: loop body
LE: loop exit
PB: predicated region body
PF: predicated region fallthrough
CT: control target
= control target key end

     0   :  { %s359_s0 = inlined_call_operand.vmem [shape: s32[4,256], index: 0, kind: input, shape index: {}]   ;;  %s360_s1 = inlined_call_operand.vmem [shape: f32[18,1], index: 1, kind: input, shape index: {}]   ;;  %s361_s2 = inlined_call_operand.<no memory space> [shape: f32[1,1], index: 2, kind: input, shape index: {}]   ;;  %s362_s3 = inlined_call_operand.hbm [shape: f32[1,256], index: 3, kind: output, shape index: {}]  }
   0x1   :  { %v8_v0 = vstv %s361_s2 }
   0x2   :  { %9 = vst [vmem:[#allocation2] sm:$0x1] %v8_v0 }
   0x3   :  { %v114_v1 = vld [vmem:[%s360_s1 + $0x7] sm:$0x1f]  ;;  %v34_v2 = vld [vmem:[%s360_s1] sm:$0x7]  ;;  %v270_v3 = vmov 0  }
   0x4   :  { %245 = vset.pattern.permute.xlu1 %v270_v3  ;;  %244 = vset.pattern.permute.xlu0 %v270_v3  ;;  %v155_v4 = vld [vmem:[%s360_s1 + $0xc] sm:$0x3f]  ;;  %v73_v5 = vld [vmem:[%s360_s1 + $0x3] sm:$0xf] }
   0x5   :  { %117 = vperm.xlu1 %245, %v114_v1   ;;  %37 = vperm.xlu0 %244, %v34_v2  }
   0x6   :  { %10 = vsyncpa [#allocation4], 0  ;;  %v17_v7 = vlaneseq  ;;  %v234_v11 = vld [vmem:[%s359_s0 + $0x2] ss:$4 sm:$0x3]  ;;  %v271_v23 = vmov 0.0  }
   0x7   :  { %v19_v12 = vld [vmem:[%s359_s0] ss:$4 sm:$0x3]  ;;  %v237_v17 = vld [vmem:[%s359_s0 + $0x3] ss:$4 sm:$0x3] }
   0x8   :  { %v310_v8 = vshrl.u32 %v17_v7, 7  ;;  %v231_v18 = vld [vmem:[%s359_s0 + $0x1] ss:$4 sm:$0x3]  ;;  %vm122_vm8 = vcmask 1044480   ;;  %vm42_vm9 = vcmask 1042432  }
   0x9   :  { %158 = vperm.xlu1 %245, %v155_v4   ;;  %76 = vperm.xlu0 %244, %v73_v5   ;;  %v180_v6 = vld [vmem:[#allocation2] sm:$0x1]  ;;  %vm163_vm10 = vcmask 1045504   ;;  %vm81_vm11 = vcmask 1043456   ;;  %s273_s0 = smov [#allocation3]   ;;  %vm212_vm12 = vcmp.lt.s32.totalorder %v17_v7, 256 }
   0xa   :  { %v313_v9 = vsub.s32 0, %v310_v8  ;;  %v26_v10 = vsub.s32 1, %v310_v8  ;;  %s221_s28 = sshll.u32 %s273_s0, 4  ;;  %s222_s28 = int_to_ptr.vmem [resolvable:$true] %s221_s28 }
   0xb   :  { %s246_s29 = scalar_lea.vmem %s222_s28, 32  ;;  %p251_p1 = scmp.lt.s32.totalorder %s222_s28, %s222_s28 }
   0xc   :  { %v103_v13 = vrot.slane %v234_v11, %v313_v9  ;;  %v107_v14 = vrot.slane %v234_v11, %v26_v10  ;;  %v23_v15 = vrot.slane %v19_v12, %v313_v9  ;;  %v27_v16 = vrot.slane %v19_v12, %v26_v10  ;;  %p247_p0 = scmp.ne.s32.totalorder %s222_s28, %s246_s29  ;;  %p252_p2 = scmp.lt.s32.totalorder %s246_s29, %s246_s29 }
   0xd   :  { %183 = vperm.xlu0 %244, %v180_v6   ;;  %v144_v19 = vrot.slane %v237_v17, %v313_v9  ;;  %v148_v20 = vrot.slane %v237_v17, %v26_v10  ;;  %v62_v21 = vrot.slane %v231_v18, %v313_v9  ;;  %v66_v22 = vrot.slane %v231_v18, %v26_v10 }
   0xe   :  { %vm108_vm0 = vcmp.eq.s32.totalorder %v103_v13, %v310_v8  ;;  %vm109_vm1 = vcmp.eq.s32.totalorder %v107_v14, %v310_v8  ;;  %vm28_vm2 = vcmp.eq.s32.totalorder %v23_v15, %v310_v8  ;;  %vm29_vm3 = vcmp.eq.s32.totalorder %v27_v16, %v310_v8  ;;  %p253_p3 = por %p252_p2, %p251_p1 }
   0xf   :  { %v235_v24 = vsel %vm108_vm0, 1.0, %v271_v23  ;;  %v236_v25 = vsel %vm109_vm1, 1.0, %v271_v23  ;;  %v229_v26 = vsel %vm28_vm2, 1.0, %v271_v23  ;;  %v230_v27 = vsel %vm29_vm3, 1.0, %v271_v23 }
  0x10   :  { %vm149_vm4 = vcmp.eq.s32.totalorder %v144_v19, %v310_v8  ;;  %vm150_vm5 = vcmp.eq.s32.totalorder %v148_v20, %v310_v8  ;;  %vm67_vm6 = vcmp.eq.s32.totalorder %v62_v21, %v310_v8  ;;  %vm68_vm7 = vcmp.eq.s32.totalorder %v66_v22, %v310_v8  ;;  %p254_p4 = pnand %p253_p3, %p247_p0 }
  0x11   :  { %v238_v34 = vsel %vm149_vm4, 1.0, %v271_v23  ;;  %v239_v35 = vsel %vm150_vm5, 1.0, %v271_v23  ;;  %v232_v36 = vsel %vm67_vm6, 1.0, %v271_v23  ;;  %v233_v37 = vsel %vm68_vm7, 1.0, %v271_v23 }
  0x84   :  { %v118_v28 = vpop.permute.xlu1 %117  ;;  %v38_v29 = vpop.permute.xlu0 %37 }
  0x85   :  { %v120_v30 = vmul.f32 %v235_v24, %v118_v28  ;;  %v121_v31 = vmul.f32 %v236_v25, %v118_v28  ;;  %v40_v32 = vmul.f32 %v229_v26, %v38_v29  ;;  %v41_v33 = vmul.f32 %v230_v27, %v38_v29 }
  0x87   :  { %v123_v38 = vsel %vm122_vm8, %v120_v30, 0.0  ;;  %v130_v39 = vsel %vm122_vm8, %v121_v31, 0.0  ;;  %v43_v40 = vsel %vm42_vm9, %v40_v32, 0.0  ;;  %v50_v41 = vsel %vm42_vm9, %v41_v33, 0.0 }
  0x88   :  { %v124_v42 = vrot.slane %v123_v38, 4  ;;  %v131_v43 = vrot.slane %v130_v39, 4  ;;  %v44_v44 = vrot.slane %v43_v40, 4  ;;  %v51_v45 = vrot.slane %v50_v41, 4  ;;  %v159_v46 = vpop.permute.xlu1 %158  ;;  %v77_v47 = vpop.permute.xlu0 %76 }
  0x89   :  { %v161_v48 = vmul.f32 %v238_v34, %v159_v46  ;;  %v162_v49 = vmul.f32 %v239_v35, %v159_v46  ;;  %v79_v50 = vmul.f32 %v232_v36, %v77_v47  ;;  %v80_v51 = vmul.f32 %v233_v37, %v77_v47 }
  0x8a   :  { %v125_v52 = vadd.f32 %v124_v42, %v123_v38  ;;  %v132_v53 = vadd.f32 %v131_v43, %v130_v39  ;;  %v45_v54 = vadd.f32 %v44_v44, %v43_v40  ;;  %v52_v55 = vadd.f32 %v51_v45, %v50_v41 }
  0x8b   :  { %v164_v56 = vsel %vm163_vm10, %v161_v48, 0.0  ;;  %v171_v57 = vsel %vm163_vm10, %v162_v49, 0.0  ;;  %v82_v58 = vsel %vm81_vm11, %v79_v50, 0.0  ;;  %v89_v59 = vsel %vm81_vm11, %v80_v51, 0.0 }
  0x8c   :  { %v126_v60 = vrot.slane %v125_v52, 2  ;;  %v133_v61 = vrot.slane %v132_v53, 2  ;;  %v46_v62 = vrot.slane %v45_v54, 2  ;;  %v53_v63 = vrot.slane %v52_v55, 2  ;;  %v184_v41 = vpop.permute.xlu0 %183 }
  0x8d   :  { %v165_v0 = vrot.slane %v164_v56, 4  ;;  %v172_v1 = vrot.slane %v171_v57, 4  ;;  %v83_v2 = vrot.slane %v82_v58, 4  ;;  %v90_v3 = vrot.slane %v89_v59, 4 }
  0x8e   :  { %v47_v4 = vadd.f32 %v46_v62, %v45_v54  ;;  %v54_v5 = vadd.f32 %v53_v63, %v52_v55  ;;  %v127_v13 = vadd.f32 %v126_v60, %v125_v52  ;;  %v134_v14 = vadd.f32 %v133_v61, %v132_v53 }
  0x8f   :  { %v166_v6 = vadd.f32 %v165_v0, %v164_v56  ;;  %v173_v10 = vadd.f32 %v172_v1, %v171_v57  ;;  %v84_v11 = vadd.f32 %v83_v2, %v82_v58  ;;  %v91_v12 = vadd.f32 %v90_v3, %v89_v59 }
  0x90   :  { %v48_v19 = vrot.slane %v47_v4, 1  ;;  %v55_v20 = vrot.slane %v54_v5, 1  ;;  %v128_v25 = vrot.slane %v127_v13, 1  ;;  %v135_v26 = vrot.slane %v134_v14, 1 }
  0x91   :  { %v167_v15 = vrot.slane %v166_v6, 2  ;;  %v174_v16 = vrot.slane %v173_v10, 2  ;;  %v85_v17 = vrot.slane %v84_v11, 2  ;;  %v92_v18 = vrot.slane %v91_v12, 2 }
  0x92   :  { %v49_v29 = vadd.f32 %v48_v19, %v47_v4  ;;  %v56_v30 = vadd.f32 %v55_v20, %v54_v5  ;;  %v272_v31 = vmov 1966171168   ;;  %v129_v39 = vadd.f32 %v128_v25, %v127_v13 }
  0x93   :  { %v168_v21 = vadd.f32 %v167_v15, %v166_v6  ;;  %v175_v22 = vadd.f32 %v174_v16, %v173_v10  ;;  %v86_v23 = vadd.f32 %v85_v17, %v84_v11  ;;  %v93_v24 = vadd.f32 %v92_v18, %v91_v12 }
  0x94   :  { %v196_v32 = vunpack.c.l.s4 %v272_v31  ;;  %v136_v40 = vadd.f32 %v135_v26, %v134_v14  ;;  %v189_v49 = vrot.slane %v184_v41, %v313_v9 }
  0x95   :  { %v87_v27 = vrot.slane %v86_v23, 1  ;;  %v94_v28 = vrot.slane %v93_v24, 1  ;;  %v169_v33 = vrot.slane %v168_v21, 1  ;;  %v176_v34 = vrot.slane %v175_v22, 1 }
  0x96   :  { %v197_v42 = vunpack.c.0.s8 %v196_v32 }
  0x97   :  { %v88_v35 = vadd.f32 %v87_v27, %v86_v23  ;;  %v95_v36 = vadd.f32 %v94_v28, %v93_v24  ;;  %v170_v45 = vadd.f32 %v169_v33, %v168_v21  ;;  %v177_v46 = vadd.f32 %v176_v34, %v175_v22 }
  0x98   :  { %v200_v52 = vsub.s32 %v197_v42, %v310_v8 }
  0x99   :  { %v96_v37 = vadd.f32 %v88_v35, %v49_v29  ;;  %v97_v38 = vadd.f32 %v95_v36, %v56_v30 }
  0x9b   :  { %v137_v43 = vadd.f32 %v129_v39, %v96_v37  ;;  %v138_v44 = vadd.f32 %v136_v40, %v97_v38 }
  0x9d   :  { %v178_v47 = vadd.f32 %v170_v45, %v137_v43  ;;  %v179_v48 = vadd.f32 %v177_v46, %v138_v44 }
  0x9f   :  { %v190_v50 = vadd.f32 %v189_v49, %v178_v47  ;;  %v191_v51 = vadd.f32 %v189_v49, %v179_v48 }
  0xa1   :  { %v194_v53 = vcombine.low %v190_v50, %v191_v51 }
  0xa3   :  { %v201_v54 = vrot.slane %v194_v53, %v200_v52 }
  0xa5   :  { %v208_v55 = vrot.slane %v201_v54, %v200_v52 }
  0xa7   :  { %214 = vst.msk [vmem:[#allocation3] sm:$0x3] %vm212_vm12, %v208_v55 }
  0xa8   :  { %257 = shalt.err (!%p254_p4)
}
  0xa9   :  { %s258_s5 = scalar_lea.hbm %s362_s3, 32 }
  0xaa   :  { %p259_p5 = scmp.ne.s32.totalorder %s362_s3, %s258_s5  ;;  %p262_p6 = scmp.lt.u32.totalorder %s258_s5, %s362_s3 }
  0xac   :  { %p264_p7 = pnand %p262_p6, %p259_p5 }
  0xae   :  { %267 = shalt.err (!%p264_p7)
}
  0xaf   :  { %224 = dma.vmem_to_hbm [thread:$0]  %s222_s28, 32, %s362_s3, [#allocation4]  }
  0xb0   :  { %268 = dma.done.wait [#allocation4], 32  }
  0xb1   :  { %269 = vsyncadd [#allocation4], 4294967264 }
  0xb2   :  { %228 = vsyncpa [#allocation4], 1 }

</bundles_post_ra>
